<compile_context>
chip_gen: v7x
topology: tpu7x:2x2x1
jax: 0.10.0
libtpu: 0.0.40
codegen_flags: <defaults>
</compile_context>

<pallas_src>
import functools
import math

import jax
import jax.numpy as jnp
import numpy as np
from jax.experimental import pallas as pl
from jax.experimental.pallas import tpu as pltpu


_SLOPE = 0.01          # LeakyReLU default negative_slope
_POOL_R = 4            # SC-branch pooling factor


def _lrelu(x):
    return jnp.maximum(x, _SLOPE * x)


# ----------------------------------------------------------------------------
# pltpu.roll sign probe (robust to either rotate convention)
# ----------------------------------------------------------------------------
_ROLL_SIGN = None


def _ensure_roll_sign():
    """Determine (once, eagerly, outside any jit trace) whether pltpu.roll
    follows jnp.roll semantics (out[i] = in[i - shift])."""
    global _ROLL_SIGN
    if _ROLL_SIGN is not None:
        return _ROLL_SIGN

    def kern(x_ref, o_ref):
        o_ref[...] = pltpu.roll(x_ref[...], shift=1, axis=1)

    x = jnp.tile(jnp.arange(256, dtype=jnp.float32)[None, :], (8, 1))
    out = pl.pallas_call(
        kern, out_shape=jax.ShapeDtypeStruct((8, 256), jnp.float32))(x)
    first = float(jax.device_get(out)[0, 0])
    _ROLL_SIGN = 1 if first == 255.0 else -1      # 255 -> jnp.roll convention
    return _ROLL_SIGN


# ----------------------------------------------------------------------------
# Host-built (numpy) constants
# ----------------------------------------------------------------------------
def _conv_masks(H, W):
    """(9, 1, H*W) f32 border masks for a 'same' 3x3 conv on flat row-major HW."""
    p = np.arange(H * W)
    py, px = p // W, p % W
    masks = np.empty((9, 1, H * W), np.float32)
    for dy in range(3):
        for dx in range(3):
            ok = ((py + dy - 1 >= 0) & (py + dy - 1 < H)
                  & (px + dx - 1 >= 0) & (px + dx - 1 < W))
            masks[dy * 3 + dx, 0] = ok.astype(np.float32)
    return jnp.asarray(masks)


def _sc_matrices(H, W, r=_POOL_R):
    """SC-branch constants (bf16):
       pool  (HW, HpWp)    : r x r average-pool matrix (entries 1/r^2, exact)
       up    (HpWp, HW)    : nearest-neighbour x r upsample matrix (0/1)
       shift (9,HpWp,HpWp) : per-tap 'same' 3x3 shift/gather matrices (0/1)."""
    Hp, Wp = H // r, W // r
    HW, HpWp = H * W, Hp * Wp
    p = np.arange(HW)
    py, px = p // W, p % W
    q = np.arange(HpWp)
    qy, qx = q // Wp, q % Wp
    member = ((py[:, None] // r) == qy[None, :]) & ((px[:, None] // r) == qx[None, :])
    pool = member.astype(np.float32) / float(r * r)
    up = member.T.astype(np.float32)
    shift = np.zeros((9, HpWp, HpWp), np.float32)
    for dy in range(3):
        for dx in range(3):
            sy, sx = qy + dy - 1, qx + dx - 1
            ok = (sy >= 0) & (sy < Hp) & (sx >= 0) & (sx < Wp)
            shift[dy * 3 + dx, (sy * Wp + sx)[ok], q[ok]] = 1.0
    return (jnp.asarray(pool, jnp.bfloat16),
            jnp.asarray(up, jnp.bfloat16),
            jnp.asarray(shift, jnp.bfloat16))


# ----------------------------------------------------------------------------
# Fused SCDAB kernel (one image per grid step, (C, H*W) layout)
# ----------------------------------------------------------------------------
def _pool_cols(v, H, W, op):
    """Reduce v:(R, H*W) over the H direction; every lane of the result holds
    its column's reduction (i.e. the pooled value broadcast over H)."""
    n = H * W
    if H & (H - 1) == 0:                         # power-of-two H: log2(H) tree
        k = W
        while k < n:
            v = op(v, pltpu.roll(v, shift=k, axis=1))
            k *= 2
        return v
    acc = v                                      # general H: H-1 steps
    for y in range(1, H):
        acc = op(acc, pltpu.roll(v, shift=(y * W) % n, axis=1))
    return acc


def _scdab_kernel(
        x_ref,
        w_head_ref, b_head_ref,
        w_sa_ref, mask_ref,
        w_cat_ref, b_cat_ref,
        w_h1_ref, b_h1_ref, w_h2_ref, b_h2_ref,
        w_w1_ref, b_w1_ref, w_w2_ref, b_w2_ref,
        w_c1_sa_ref, w_c1_ca_ref, b_c1_ref,
        w_c3_ref, b_c3_ref,
        pool_ref, shift_ref, w_sc_ref, b_sc_ref, up_ref,
        w_tail_ref, b_tail_ref,
        o_ref,
        *, H, W, roll_sign):
    f32 = jnp.float32
    bf16 = jnp.bfloat16
    HW = H * W
    C = x_ref.shape[1]

    def tap(v, dy, dx):
        """v[:, p] -> v[:, p + (dy-1)*W + (dx-1)], zero outside the image."""
        if dy == 1 and dx == 1:
            return v
        s = (dy - 1) * W + (dx - 1)
        t = pltpu.roll(v, shift=(-roll_sign * s) % HW, axis=1)
        return t * mask_ref[dy * 3 + dx]         # (1, HW) border mask, bcast

    def conv3x3(v, w_ref, b_ref):
        """'same' 3x3 conv, (Cin, HW) -> (Cout, HW); w_ref is (Cout, 9*Cin) bf16."""
        patches = jnp.concatenate(
            [tap(v, dy, dx).astype(bf16) for dy in range(3) for dx in range(3)],
            axis=0)                              # (9*Cin, HW), aligned stacking
        return (jnp.dot(w_ref[...], patches, preferred_element_type=f32)
                + b_ref[...])

    x = x_ref[0]                                 # (C, HW) f32, residual input

    # ---- head: 3x3 conv + bias + LeakyReLU ----
    h = _lrelu(conv3x3(x, w_head_ref, b_head_ref))
    h_bf = h.astype(bf16)

    # ---- spatial attention: channel max/mean -> 3x3 conv (2->1) -> sigmoid ----
    cmax = jnp.max(h, axis=0, keepdims=True)     # (1, HW)
    cmean = jnp.mean(h, axis=0, keepdims=True)   # (1, HW)
    sa_logit = jnp.zeros((1, HW), f32)
    for dy in range(3):
        for dx in range(3):
            k = 2 * (dy * 3 + dx)
            sa_logit = (sa_logit
                        + w_sa_ref[0, k] * tap(cmax, dy, dx)
                        + w_sa_ref[0, k + 1] * tap(cmean, dy, dx))
    sa = h * jax.nn.sigmoid(sa_logit)

    # ---- channel attention (CALayer1); H-pooled values kept broadcast over H ----
    avg_h = _pool_cols(h, H, W, jnp.add) * (1.0 / H)
    max_h = _pool_cols(h, H, W, jnp.maximum)
    cat = jnp.concatenate([avg_h, max_h], axis=0).astype(bf16)       # (2C, HW)
    y = _lrelu(jnp.dot(w_cat_ref[...], cat, preferred_element_type=f32)
               + b_cat_ref[...])
    y1 = y[:C].astype(bf16)
    y2 = y[C:].astype(bf16)
    t1 = jnp.maximum(jnp.dot(w_h1_ref[...], y1, preferred_element_type=f32)
                     + b_h1_ref[...], 0.0)
    g1 = (jnp.dot(w_h2_ref[...], t1.astype(bf16), preferred_element_type=f32)
          + b_h2_ref[...])
    t2 = jnp.maximum(jnp.dot(w_w1_ref[...], y2, preferred_element_type=f32)
                     + b_w1_ref[...], 0.0)
    g2 = (jnp.dot(w_w2_ref[...], t2.astype(bf16), preferred_element_type=f32)
          + b_w2_ref[...])
    ca = h * jax.nn.sigmoid(g1) * jax.nn.sigmoid(g2)

    # ---- conv1x1 path: 1x1 over channel concat (split-K, no concat) + 3x3 ----
    x1 = (jnp.dot(w_c1_sa_ref[...], sa.astype(bf16), preferred_element_type=f32)
          + jnp.dot(w_c1_ca_ref[...], ca.astype(bf16), preferred_element_type=f32)
          + b_c1_ref[...])
    x1 = conv3x3(x1, w_c3_ref, b_c3_ref)

    # ---- SC path: avgpool4 -> 3x3 conv (BN folded) -> nearest x4 upsample ----
    pooled = jnp.dot(h_bf, pool_ref[...], preferred_element_type=f32)    # (C, HpWp)
    pooled_bf = pooled.astype(bf16)
    sc_patches = jnp.concatenate(
        [jnp.dot(pooled_bf, shift_ref[t], preferred_element_type=f32).astype(bf16)
         for t in range(9)], axis=0)                                     # (9C, HpWp)
    sc = (jnp.dot(w_sc_ref[...], sc_patches, preferred_element_type=f32)
          + b_sc_ref[...])
    up = jnp.dot(sc.astype(bf16), up_ref[...], preferred_element_type=f32)  # (C, HW)

    # ---- gate, tail conv, residual add, LeakyReLU ----
    prod = x1 * jax.nn.sigmoid(h + up)
    o_ref[0] = _lrelu(conv3x3(prod, w_tail_ref, b_tail_ref) + x)


# ----------------------------------------------------------------------------
# Wrapper
# ----------------------------------------------------------------------------
_PREP_ORDER = (
    "w_head", "b_head", "w_sa", "masks",
    "w_cat", "b_cat", "w_h1", "b_h1", "w_h2", "b_h2",
    "w_w1", "b_w1", "w_w2", "b_w2",
    "w_c1_sa", "w_c1_ca", "b_c1", "w_c3", "b_c3",
    "pool", "shifts", "w_sc", "b_sc", "up", "w_tail", "b_tail")


def _zero_map(nd):
    return lambda n: (0,) * nd


def scdab_forward(x_nchw, prep):
    """SCDAB forward. x_nchw: (N, C, H, W) f32; prep: prepare_params() output."""
    N, C, H, W = x_nchw.shape
    if H % _POOL_R or W % _POOL_R:
        raise ValueError("SCDAB needs H and W divisible by 4")
    HW = H * W
    Hp, Wp = H // _POOL_R, W // _POOL_R
    HpWp = Hp * Wp
    Cr = prep["w_h1"].shape[0]
    x_flat = x_nchw.astype(jnp.float32).reshape(N, C, HW)

    in_specs = [pl.BlockSpec((1, C, HW), lambda n: (n, 0, 0))]
    args = [x_flat]
    for key in _PREP_ORDER:
        a = prep[key]
        if key == "w_sa":                       # 18 scalar conv taps -> SMEM
            in_specs.append(pl.BlockSpec(a.shape, _zero_map(a.ndim),
                                         memory_space=pltpu.MemorySpace.SMEM))
        else:
            in_specs.append(pl.BlockSpec(a.shape, _zero_map(a.ndim)))
        args.append(a)

    macs = (3 * C * 9 * C * HW                  # head / conv1x1[1] / tail 3x3
            + 4 * C * C * HW                    # CA 2C->2C 1x1
            + 4 * Cr * C * HW                   # CA F_h / F_w MLPs
            + 2 * C * C * HW                    # 1x1 over SA/CA concat (split-K)
            + C * HW * HpWp                     # avg-pool matmul
            + 9 * C * HpWp * HpWp               # SC shift gathers
            + 9 * C * C * HpWp                  # SC 3x3 conv
            + C * HpWp * HW)                    # nearest x4 upsample matmul
    weight_bytes = sum(int(np.prod(prep[k].shape)) * prep[k].dtype.itemsize
                       for k in _PREP_ORDER)
    cost = pl.CostEstimate(flops=2 * N * macs,
                           transcendentals=N * HW * (3 * C + 2),
                           bytes_accessed=8 * N * C * HW + weight_bytes)

    kernel = functools.partial(
        _scdab_kernel, H=H, W=W,
        roll_sign=_ROLL_SIGN if _ROLL_SIGN is not None else 1)

    out = pl.pallas_call(
        kernel,
        out_shape=jax.ShapeDtypeStruct((N, C, HW), jnp.float32),
        grid=(N,),
        in_specs=in_specs,
        out_specs=pl.BlockSpec((1, C, HW), lambda n: (n, 0, 0)),
        compiler_params=pltpu.CompilerParams(
            dimension_semantics=("parallel",),
            # Per-step working set is < 2 MiB; 32 MiB leaves headroom on every
            # generation including v7x (64 MiB physical VMEM).
            vmem_limit_bytes=32 * 1024 * 1024),
        cost_estimate=cost,
    )(*args)
    return out.reshape(N, C, H, W)


# ----------------------------------------------------------------------------
# Parameters: logical init (PyTorch-equivalent) + one-time kernel-layout prep
# ----------------------------------------------------------------------------
def init_params(key, C, reduction=16):
    Cr = max(C // reduction, 1)

    def conv_w(k, cin, cout):
        return jax.random.normal(k, (3, 3, cin, cout), jnp.float32) / math.sqrt(9.0 * cin)

    def dense_w(k, cin, cout):
        return jax.random.normal(k, (cin, cout), jnp.float32) / math.sqrt(float(cin))

    def bias(k, c):
        return 0.05 * jax.random.normal(k, (c,), jnp.float32)

    def bn_params(k, c):
        k1, k2, k3, k4 = jax.random.split(k, 4)
        gamma = 1.0 + 0.1 * jax.random.normal(k1, (c,), jnp.float32)
        beta = 0.1 * jax.random.normal(k2, (c,), jnp.float32)
        mean = 0.1 * jax.random.normal(k3, (c,), jnp.float32)
        var = jax.random.uniform(k4, (c,), jnp.float32, minval=0.5, maxval=1.5)
        return gamma, beta, mean, var

    def fold_bn(w, b, bn, eps=1e-5):
        gamma, beta, mean, var = bn
        scale = gamma / jnp.sqrt(var + eps)     # along the output-channel axis
        return w * scale, (b - mean) * scale + beta

    keys = iter(jax.random.split(key, 40))
    p = {}
    p["w_head"] = conv_w(next(keys), C, C)
    p["b_head"] = bias(next(keys), C)
    # SC: conv3x3 + BN folded (inference form)
    w_sc = conv_w(next(keys), C, C)
    b_sc = bias(next(keys), C)
    p["w_sc"], p["b_sc"] = fold_bn(w_sc, b_sc, bn_params(next(keys), C))
    # SA: 3x3 conv, 2 -> 1 channel, no bias.  Layout (kh, kw, {max, mean}).
    p["w_sa"] = jax.random.normal(next(keys), (3, 3, 2), jnp.float32) / math.sqrt(18.0)
    # CA (CALayer1), BN folded into preceding 1x1 convs
    ca = {}
    w_cat = dense_w(next(keys), 2 * C, 2 * C)
    ca["w_cat"], ca["b_cat"] = fold_bn(w_cat, jnp.zeros((2 * C,), jnp.float32),
                                       bn_params(next(keys), 2 * C))
    w_h1, b_h1 = dense_w(next(keys), C, Cr), bias(next(keys), Cr)
    ca["w_h1"], ca["b_h1"] = fold_bn(w_h1, b_h1, bn_params(next(keys), Cr))
    ca["w_h2"], ca["b_h2"] = dense_w(next(keys), Cr, C), bias(next(keys), C)
    w_w1, b_w1 = dense_w(next(keys), C, Cr), bias(next(keys), Cr)
    ca["w_w1"], ca["b_w1"] = fold_bn(w_w1, b_w1, bn_params(next(keys), Cr))
    ca["w_w2"], ca["b_w2"] = dense_w(next(keys), Cr, C), bias(next(keys), C)
    p["ca"] = ca
    # conv1x1 Sequential: 1x1 (2C -> C, bias) then 3x3 (C -> C, bias)
    p["w_c1"], p["b_c1"] = dense_w(next(keys), 2 * C, C), bias(next(keys), C)
    p["w_c3"], p["b_c3"] = conv_w(next(keys), C, C), bias(next(keys), C)
    # tail
    p["w_tail"], p["b_tail"] = conv_w(next(keys), C, C), bias(next(keys), C)
    return p


def prepare_params(params, H, W):
    """One-time, outside-jit conversion of logical params to kernel layout."""
    _ensure_roll_sign()
    bf16 = jnp.bfloat16
    f32 = jnp.float32
    C = params["w_head"].shape[3]

    def fold3x3(w):                          # (3,3,Cin,Cout) -> (Cout, 9*Cin) bf16
        kh, kw, cin, cout = w.shape
        wt = jnp.transpose(jnp.reshape(w, (kh * kw, cin, cout)), (2, 0, 1))
        return jnp.reshape(wt, (cout, kh * kw * cin)).astype(bf16)

    def dense_t(w):                          # (in, out) -> (out, in) bf16
        return jnp.transpose(w).astype(bf16)

    def col(b):                              # (c,) -> (c, 1) f32
        return jnp.reshape(b, (-1, 1)).astype(f32)

    ca = params["ca"]
    pool, up, shifts = _sc_matrices(H, W)
    return dict(
        w_head=fold3x3(params["w_head"]), b_head=col(params["b_head"]),
        w_sa=jnp.reshape(params["w_sa"], (1, 18)).astype(f32),
        masks=_conv_masks(H, W),
        w_cat=dense_t(ca["w_cat"]), b_cat=col(ca["b_cat"]),
        w_h1=dense_t(ca["w_h1"]), b_h1=col(ca["b_h1"]),
        w_h2=dense_t(ca["w_h2"]), b_h2=col(ca["b_h2"]),
        w_w1=dense_t(ca["w_w1"]), b_w1=col(ca["b_w1"]),
        w_w2=dense_t(ca["w_w2"]), b_w2=col(ca["b_w2"]),
        w_c1_sa=dense_t(params["w_c1"][:C]),
        w_c1_ca=dense_t(params["w_c1"][C:]),
        b_c1=col(params["b_c1"]),
        w_c3=fold3x3(params["w_c3"]), b_c3=col(params["b_c3"]),
        pool=pool, shifts=shifts,
        w_sc=fold3x3(params["w_sc"]), b_sc=col(params["b_sc"]),
        up=up,
        w_tail=fold3x3(params["w_tail"]), b_tail=col(params["b_tail"]),
    )


# ----------------------------------------------------------------------------
# Pure-JAX reference (for correctness check)
# ----------------------------------------------------------------------------
def _conv3x3_ref(x, w, b):
    y = jax.lax.conv_general_dilated(
        x, w, (1, 1), "SAME", dimension_numbers=("NHWC", "HWIO", "NHWC"),
        precision=jax.lax.Precision.HIGHEST)
    return y + b


def _lrelu_ref(x):
    return jnp.where(x >= 0, x, _SLOPE * x)


def scdab_forward_ref(x_nchw, params):
    x = jnp.transpose(x_nchw, (0, 2, 3, 1)).astype(jnp.float32)
    N, H, W, C = x.shape
    res = x
    h = _lrelu_ref(_conv3x3_ref(x, params["w_head"], params["b_head"]))
    # SA
    comp = jnp.concatenate([jnp.max(h, axis=-1, keepdims=True),
                            jnp.mean(h, axis=-1, keepdims=True)], axis=-1)
    s = jax.lax.conv_general_dilated(
        comp, params["w_sa"][..., None], (1, 1), "SAME",
        dimension_numbers=("NHWC", "HWIO", "NHWC"),
        precision=jax.lax.Precision.HIGHEST)
    sa = h * jax.nn.sigmoid(s)
    # CA
    ca_p = params["ca"]
    cat = jnp.concatenate([jnp.mean(h, axis=1), jnp.max(h, axis=1)], axis=-1)
    hp = jax.lax.Precision.HIGHEST
    y = _lrelu_ref(jnp.einsum("nwc,cd->nwd", cat, ca_p["w_cat"], precision=hp)
                   + ca_p["b_cat"])
    y1, y2 = y[..., :C], y[..., C:]
    t1 = jnp.maximum(jnp.einsum("nwc,cd->nwd", y1, ca_p["w_h1"], precision=hp)
                     + ca_p["b_h1"], 0.0)
    s1 = jnp.einsum("nwc,cd->nwd", t1, ca_p["w_h2"], precision=hp) + ca_p["b_h2"]
    t2 = jnp.maximum(jnp.einsum("nwc,cd->nwd", y2, ca_p["w_w1"], precision=hp)
                     + ca_p["b_w1"], 0.0)
    s2 = jnp.einsum("nwc,cd->nwd", t2, ca_p["w_w2"], precision=hp) + ca_p["b_w2"]
    gate = jax.nn.sigmoid(s1) * jax.nn.sigmoid(s2)
    ca = h * gate[:, None, :, :]
    # conv1x1 path
    x1 = (jnp.einsum("nhwc,cd->nhwd", jnp.concatenate([sa, ca], axis=-1),
                     params["w_c1"], precision=hp) + params["b_c1"])
    x1 = _conv3x3_ref(x1, params["w_c3"], params["b_c3"])
    # SC path + gate
    pooled = jnp.mean(h.reshape(N, H // 4, 4, W // 4, 4, C), axis=(2, 4))
    sc = _conv3x3_ref(pooled, params["w_sc"], params["b_sc"])
    up = jnp.repeat(jnp.repeat(sc, 4, axis=1), 4, axis=2)
    prod = x1 * jax.nn.sigmoid(h + up)
    out = _lrelu_ref(_conv3x3_ref(prod, params["w_tail"], params["b_tail"]) + res)
    return jnp.transpose(out, (0, 3, 1, 2))


# ----------------------------------------------------------------------------
if __name__ == "__main__":
    key = jax.random.PRNGKey(0)
    key, kx, kp = jax.random.split(key, 3)

    # n_feat must be >= reduction (16) for CALayer1; spatial divisible by 4.
    N, C, H, W = 2, 32, 16, 16
    x = jax.random.normal(kx, (N, C, H, W), jnp.float32)
    params = init_params(kp, C, reduction=16)
    prep = prepare_params(params, H, W)          # bf16 weights, host constants

    out = jax.block_until_ready(jax.jit(scdab_forward)(x, prep))
    assert out.shape == (N, C, H, W), out.shape

    ref = jax.block_until_ready(jax.jit(scdab_forward_ref)(x, params))
    max_err = float(jnp.max(jnp.abs(out - ref)))
    assert jnp.allclose(out, ref, rtol=5e-2, atol=5e-2), max_err

    print("KERNEL_OK")
</pallas_src>

<mosaic_0001>
module attributes {stable_mosaic.version = 11 : i64} {
  func.func @kern(%arg0: memref<8x256xf32, #tpu.memory_space<vmem>>, %arg1: memref<8x256xf32, #tpu.memory_space<vmem>>) attributes {dimension_semantics = [], scalar_prefetch = 0 : i64, scratch_operands = 0 : i64, tpu.core_type = #tpu.core_type<tc>} {
    %c0 = arith.constant 0 : index
    %c0_0 = arith.constant 0 : index
    %0 = vector.load %arg0[%c0, %c0_0] : memref<8x256xf32, #tpu.memory_space<vmem>>, vector<8x256xf32>
    %c1_i32 = arith.constant 1 : i32
    %1 = tpu.dynamic_rotate %0 by %c1_i32 dim 1 : vector<8x256xf32>, i32 -> vector<8x256xf32>
    %c0_1 = arith.constant 0 : index
    %c0_2 = arith.constant 0 : index
    %2 = vector.load %arg1[%c0_1, %c0_2] : memref<8x256xf32, #tpu.memory_space<vmem>>, vector<8x256xf32>
    tpu.vector_store %arg1[%c0_1, %c0_2], %1 {strides = array<i32>} : memref<8x256xf32, #tpu.memory_space<vmem>>, vector<8x256xf32>,
    return
  }
}

</mosaic_0001>

<bundles_post_ra>
// kernel: tpu_custom_call.1
= control target key start
LH: loop header
LB: loop body
LE: loop exit
PB: predicated region body
PF: predicated region fallthrough
CT: control target
= control target key end

     0   :  { %6 = vsyncpa [#allocation3], 0  ;;  %s137_s0 = inlined_call_operand.hbm [shape: f32[8,256], index: 0, kind: input, shape index: {}]   ;;  %s138_s1 = inlined_call_operand.hbm [shape: f32[8,256], index: 1, kind: output, shape index: {}]  }
   0x1   :  { %7 = vsyncpa [#allocation4], 0  ;;  %s100_s6 = smov [#allocation2]   ;;  %s52_s10 = scalar_lea.hbm %s137_s0, 256 }
   0x2   :  { %s14_s7 = sshll.u32 %s100_s6, 4  ;;  %p53_p0 = scmp.ne.s32.totalorder %s137_s0, %s52_s10  ;;  %s15_s7 = int_to_ptr.vmem [resolvable:$true] %s14_s7 }
   0x3   :  { %p56_p1 = scmp.lt.u32.totalorder %s52_s10, %s137_s0 }
   0x5   :  { %p58_p2 = pnand %p56_p1, %p53_p0 }
   0x7   :  { %61 = shalt.err (!%p58_p2)
}
   0x8   :  { %s62_s15 = scalar_lea.vmem %s15_s7, 256  ;;  %p67_p4 = scmp.lt.s32.totalorder %s15_s7, %s15_s7 }
   0x9   :  { %p63_p3 = scmp.ne.s32.totalorder %s15_s7, %s62_s15  ;;  %p68_p5 = scmp.lt.s32.totalorder %s62_s15, %s62_s15 }
   0xb   :  { %p69_p6 = por %p68_p5, %p67_p4 }
   0xd   :  { %p70_p7 = pnand %p69_p6, %p63_p3 }
   0xf   :  { %73 = shalt.err (!%p70_p7)
}
  0x10   :  { %17 = dma.hbm_to_vmem [thread:$0]  %s137_s0, 256, %s15_s7, [#allocation3]  }
  0x11   :  { %96 = dma.done.wait [#allocation3], 256  }
  0x12   :  { %97 = vsyncadd [#allocation3], 4294967040  ;;  %v21_v0 = vld [vmem:[#allocation2] sm:$0xff]  ;;  %s101_s18 = smov 1   ;;  %v22_v1 = vld [vmem:[#allocation2 + $0x8] sm:$0xff]  ;;  %v27_v2 = vlaneseq  ;;  %s102_s19 = smov [#allocation5]  }
  0x13   :  { %23 = vrot.lane.b32.xlu0 %v21_v0, %s101_s18  ;;  %s40_s20 = sshll.u32 %s102_s19, 4  ;;  %s41_s20 = int_to_ptr.vmem [resolvable:$true] %s40_s20 }
  0x14   :  { %v28_v3 = vand.u32 127, %v27_v2  ;;  %s74_s0 = scalar_lea.vmem %s41_s20, 256  ;;  %p79_p9 = scmp.lt.s32.totalorder %s41_s20, %s41_s20 }
  0x15   :  { %p75_p8 = scmp.ne.s32.totalorder %s41_s20, %s74_s0  ;;  %p80_p10 = scmp.lt.s32.totalorder %s74_s0, %s74_s0 }
  0x16   :  { %vm29_vm0 = vcmp.lt.s32.totalorder %v28_v3, 1 }
  0x17   :  { %25 = vrot.lane.b32.xlu0 %v22_v1, %s101_s18  ;;  %p81_p11 = por %p80_p10, %p79_p9 }
  0x19   :  { %p82_p12 = pnand %p81_p11, %p75_p8 }
  0x85   :  { %v24_v4 = vpop.permute.xlu0 %23 }
  0x89   :  { %v26_v5 = vpop.permute.xlu0 %25 }
  0x8a   :  { %v30_v6 = vsel %vm29_vm0, %v24_v4, %v26_v5  ;;  %v31_v7 = vsel %vm29_vm0, %v26_v5, %v24_v4 }
  0x8b   :  { %32 = vst [vmem:[#allocation5] sm:$0xff] %v31_v7  ;;  %33 = vst [vmem:[#allocation5 + $0x8] sm:$0xff] %v30_v6 }
  0x8c   :  { %85 = shalt.err (!%p82_p12)
}
  0x8d   :  { %s86_s23 = scalar_lea.hbm %s138_s1, 256 }
  0x8e   :  { %p87_p13 = scmp.ne.s32.totalorder %s138_s1, %s86_s23  ;;  %p90_p0 = scmp.lt.u32.totalorder %s86_s23, %s138_s1 }
  0x90   :  { %p92_p1 = pnand %p90_p0, %p87_p13 }
  0x92   :  { %95 = shalt.err (!%p92_p1)
}
  0x93   :  { %43 = dma.vmem_to_hbm [thread:$0]  %s41_s20, 256, %s138_s1, [#allocation4]  }
  0x94   :  { %98 = dma.done.wait [#allocation4], 256  }
  0x95   :  { %99 = vsyncadd [#allocation4], 4294967040 }
  0x96   :  { %47 = vsyncpa [#allocation3], 1 }
  0x97   :  { %48 = vsyncpa [#allocation4], 1 }

</bundles_post_ra>
